<compile_context>
chip_gen: v7x
topology: tpu7x:2x2x1
jax: 0.10.0
libtpu: 0.0.40
codegen_flags: <defaults>
</compile_context>

<pallas_src>
import functools

import jax
import jax.numpy as jnp
from jax.experimental import pallas as pl
from jax.experimental.pallas import tpu as pltpu

_LANE = 128     # lane width (last dim)
_SUBLANE = 8    # f32 sublane count (second-to-last dim)
_TM_MAX = 256   # full MXU-height row tile on v6e/v7x (two passes on v5e's 128x128)


def _round_up(x: int, m: int) -> int:
    return ((x + m - 1) // m) * m


def _fused_mlp_kernel(*refs, relu_flags):
    """refs = (x_ref, w0, b0, w1, b1, ..., o_ref); one (TM, ...) row tile.

    Matmuls: bf16 x bf16 on the MXU with f32 accumulation.  Bias-add + ReLU
    run on the VPU in f32.  Intermediate activations never leave vregs/VMEM.
    """
    x_ref = refs[0]
    o_ref = refs[-1]
    param_refs = refs[1:-1]

    h = x_ref[...].astype(jnp.float32)
    for i, relu in enumerate(relu_flags):
        w_ref = param_refs[2 * i]
        b_ref = param_refs[2 * i + 1]
        h = jnp.dot(h.astype(jnp.bfloat16), w_ref[...],
                    preferred_element_type=jnp.float32)
        h = h + b_ref[...]            # f32 epilogue (optimal on all generations)
        if relu:
            h = jnp.maximum(h, 0.0)
    o_ref[...] = h.astype(o_ref.dtype)


def _mlp_forward_pallas(x, padded_params, *, relu_flags, out_features):
    """Fused MLP forward: (optional M-pad) -> one pallas_call -> un-pad slice."""
    m, k = x.shape
    n_out_pad = padded_params[-1][0].shape[1]

    # Row tiling: full MXU-height tiles for large batches; otherwise only pad
    # to the 8-row f32 sublane quantum.  K of the input is never padded.
    tm = _TM_MAX if m >= _TM_MAX else _round_up(max(m, _SUBLANE), _SUBLANE)
    m_pad = _round_up(m, tm)
    x_in = x if m_pad == m else jnp.zeros((m_pad, k), x.dtype).at[:m, :].set(x)

    flat_params = []
    in_specs = [pl.BlockSpec((tm, k), lambda i: (i, 0))]
    for w, b in padded_params:
        flat_params.append(w)
        flat_params.append(b)
        # Full-array blocks with a constant index -> stay VMEM-resident across
        # all M tiles.
        in_specs.append(pl.BlockSpec(w.shape, lambda i: (0, 0)))
        in_specs.append(pl.BlockSpec(b.shape, lambda i: (0, 0)))
    out_spec = pl.BlockSpec((tm, n_out_pad), lambda i: (i, 0))

    # VMEM budget: double-buffered params + I/O tiles + activation working set,
    # with headroom; clamped to [32 MiB, 64 MiB] (64 MiB = v7x physical).
    param_bytes = sum(int(a.size) * a.dtype.itemsize for a in flat_params)
    max_width = max([k] + [int(w.shape[1]) for w, _ in padded_params])
    act_bytes = tm * max_width * 4
    io_bytes = 2 * (tm * k * 4) + 2 * (tm * n_out_pad * 4)
    vmem_bytes = int(2 * param_bytes + 4 * act_bytes + io_bytes + (4 << 20))
    vmem_bytes = min(max(vmem_bytes, 32 << 20), 64 << 20)

    flops = sum(2 * m_pad * int(w.shape[0]) * int(w.shape[1])
                for w, _ in padded_params)
    bytes_accessed = (int(x_in.size) * x_in.dtype.itemsize + param_bytes
                      + m_pad * n_out_pad * 4)

    out_pad = pl.pallas_call(
        functools.partial(_fused_mlp_kernel, relu_flags=relu_flags),
        out_shape=jax.ShapeDtypeStruct((m_pad, n_out_pad), jnp.float32),
        grid=(m_pad // tm,),
        in_specs=in_specs,
        out_specs=out_spec,
        compiler_params=pltpu.CompilerParams(
            dimension_semantics=("parallel",),   # shard M tiles across TCs (v7x)
            vmem_limit_bytes=vmem_bytes),
        cost_estimate=pl.CostEstimate(
            flops=flops, transcendentals=0, bytes_accessed=bytes_accessed),
    )(x_in, *flat_params)

    return out_pad[:m, :out_features]


class MLP:
    """JAX/Pallas port of the PyTorch MLP module.

    layers: Linear -> ReLU -> ... -> Linear (last activation popped),
    optional final_activation ("relu" or None).
    """

    def __init__(self, layer_sizes, key, final_activation=None):
        self.layer_sizes = list(layer_sizes)
        self.final_activation = final_activation

        self.params = []          # exact f32 params (reference use)
        self.padded_params = []   # lane-padded bf16 W / f32 b fed to the kernel
        n_layers = len(layer_sizes) - 1
        relu_flags = []
        for i in range(n_layers):
            fan_in = layer_sizes[i]
            fan_out = layer_sizes[i + 1]
            key, wk, bk = jax.random.split(key, 3)
            # Match torch.nn.Linear default init: U(-1/sqrt(fan_in), 1/sqrt(fan_in))
            bound = 1.0 / (fan_in ** 0.5)
            w = jax.random.uniform(
                wk, (fan_in, fan_out), jnp.float32, minval=-bound, maxval=bound)
            b = jax.random.uniform(
                bk, (fan_out,), jnp.float32, minval=-bound, maxval=bound)
            self.params.append((w, b))

            # Layer 0 keeps its true K (x is fed unpadded along features);
            # deeper layers see the 128-padded activation width of layer i-1.
            # N is always padded to 128 (lane-dense).  Zero padding is inert.
            k_pad = fan_in if i == 0 else _round_up(fan_in, _LANE)
            n_pad = _round_up(fan_out, _LANE)
            w_pad = (jnp.zeros((k_pad, n_pad), jnp.float32)
                     .at[:fan_in, :fan_out].set(w).astype(jnp.bfloat16))
            b_pad = jnp.zeros((1, n_pad), jnp.float32).at[0, :fan_out].set(b)
            self.padded_params.append((w_pad, b_pad))

            is_last = i == n_layers - 1
            relu_flags.append((final_activation == "relu") if is_last else True)

        self._forward = jax.jit(
            functools.partial(
                _mlp_forward_pallas,
                relu_flags=tuple(relu_flags),
                out_features=layer_sizes[-1]))

    def __call__(self, x):
        return self._forward(x, self.padded_params)


def _reference_forward(mlp: MLP, x):
    # Pure-JAX reference using the same precision recipe as the kernel:
    # bf16 LHS x bf16 W with f32 accumulation, f32 bias/ReLU.
    n_layers = len(mlp.params)
    h = x.astype(jnp.float32)
    for idx, (w, b) in enumerate(mlp.params):
        h = jnp.dot(h.astype(jnp.bfloat16), w.astype(jnp.bfloat16),
                    preferred_element_type=jnp.float32) + b
        is_last = idx == n_layers - 1
        if (not is_last) or (mlp.final_activation == "relu"):
            h = jnp.maximum(h, 0.0)
    return h


if __name__ == "__main__":
    key = jax.random.PRNGKey(0)
    key, xk, xk2, pk = jax.random.split(key, 4)

    layer_sizes = [16, 32, 32, 8]   # small MLP: 3 Linear layers, ReLU between
    mlp = MLP(layer_sizes, key=pk, final_activation=None)

    # Small batch: single 8-row tile, grid=(1,).
    x_small = jax.random.normal(xk, (4, layer_sizes[0]), jnp.float32)
    out_small = jax.block_until_ready(mlp(x_small))
    ref_small = _reference_forward(mlp, x_small)
    assert out_small.shape == (4, layer_sizes[-1]), out_small.shape
    assert jnp.allclose(out_small, ref_small, atol=2e-3, rtol=2e-3), \
        "mismatch vs reference (small batch)"

    # Larger batch: exercises the 256-row tiles and the parallel M grid.
    x_big = jax.random.normal(xk2, (512, layer_sizes[0]), jnp.float32)
    out_big = jax.block_until_ready(mlp(x_big))
    ref_big = _reference_forward(mlp, x_big)
    assert out_big.shape == (512, layer_sizes[-1]), out_big.shape
    assert jnp.allclose(out_big, ref_big, atol=2e-3, rtol=2e-3), \
        "mismatch vs reference (large batch)"

    print("KERNEL_OK")
</pallas_src>

<mosaic_0001>
module attributes {stable_mosaic.version = 11 : i64} {
  func.func @_fused_mlp_kernel(%arg0: i32, %arg1: memref<8x16xf32, #tpu.memory_space<vmem>>, %arg2: memref<16x128xbf16, #tpu.memory_space<vmem>>, %arg3: memref<1x128xf32, #tpu.memory_space<vmem>>, %arg4: memref<128x128xbf16, #tpu.memory_space<vmem>>, %arg5: memref<1x128xf32, #tpu.memory_space<vmem>>, %arg6: memref<128x128xbf16, #tpu.memory_space<vmem>>, %arg7: memref<1x128xf32, #tpu.memory_space<vmem>>, %arg8: memref<8x128xf32, #tpu.memory_space<vmem>>) attributes {dimension_semantics = [#tpu.dimension_semantics<parallel>], iteration_bounds = array<i64: 1>, scalar_prefetch = 0 : i64, scratch_operands = 0 : i64, tpu.core_type = #tpu.core_type<tc>, window_params = [{transform_indices = @transform_0, window_bounds = array<i64: 8, 16>}, {pipeline_mode = #tpu.pipeline_mode<synchronous>, transform_indices = @transform_1, window_bounds = array<i64: 16, 128>}, {pipeline_mode = #tpu.pipeline_mode<synchronous>, transform_indices = @transform_2, window_bounds = array<i64: 1, 128>}, {pipeline_mode = #tpu.pipeline_mode<synchronous>, transform_indices = @transform_3, window_bounds = array<i64: 128, 128>}, {pipeline_mode = #tpu.pipeline_mode<synchronous>, transform_indices = @transform_4, window_bounds = array<i64: 1, 128>}, {pipeline_mode = #tpu.pipeline_mode<synchronous>, transform_indices = @transform_5, window_bounds = array<i64: 128, 128>}, {pipeline_mode = #tpu.pipeline_mode<synchronous>, transform_indices = @transform_6, window_bounds = array<i64: 1, 128>}, {transform_indices = @transform_7, window_bounds = array<i64: 8, 128>}]} {
    %c0 = arith.constant 0 : index
    %c0_0 = arith.constant 0 : index
    %0 = vector.load %arg1[%c0, %c0_0] : memref<8x16xf32, #tpu.memory_space<vmem>>, vector<8x16xf32>
    %1 = arith.truncf %0 : vector<8x16xf32> to vector<8x16xbf16>
    %c0_1 = arith.constant 0 : index
    %c0_2 = arith.constant 0 : index
    %2 = vector.load %arg2[%c0_1, %c0_2] : memref<16x128xbf16, #tpu.memory_space<vmem>>, vector<16x128xbf16>
    %cst = arith.constant dense<0.000000e+00> : vector<8x128xf32>
    %3 = tpu.matmul %1, %2, %cst {dimension_numbers = #tpu.dot_dimension_numbers<[1], [0], [0], [1], [0, 0, 1, 1], [], []>} : vector<8x16xbf16>, vector<16x128xbf16>, vector<8x128xf32> -> vector<8x128xf32>
    %c0_3 = arith.constant 0 : index
    %c0_4 = arith.constant 0 : index
    %4 = vector.load %arg3[%c0_3, %c0_4] : memref<1x128xf32, #tpu.memory_space<vmem>>, vector<1x128xf32>
    %5 = vector.broadcast %4 : vector<1x128xf32> to vector<8x128xf32>
    %6 = arith.addf %3, %5 : vector<8x128xf32>
    %cst_5 = arith.constant 0.000000e+00 : f32
    %7 = vector.broadcast %cst_5 : f32 to vector<8x128xf32>
    %8 = arith.maximumf %6, %7 : vector<8x128xf32>
    %9 = arith.truncf %8 : vector<8x128xf32> to vector<8x128xbf16>
    %c0_6 = arith.constant 0 : index
    %c0_7 = arith.constant 0 : index
    %10 = vector.load %arg4[%c0_6, %c0_7] : memref<128x128xbf16, #tpu.memory_space<vmem>>, vector<128x128xbf16>
    %cst_8 = arith.constant dense<0.000000e+00> : vector<8x128xf32>
    %11 = tpu.matmul %9, %10, %cst_8 {dimension_numbers = #tpu.dot_dimension_numbers<[1], [0], [0], [1], [0, 0, 1, 1], [], []>} : vector<8x128xbf16>, vector<128x128xbf16>, vector<8x128xf32> -> vector<8x128xf32>
    %c0_9 = arith.constant 0 : index
    %c0_10 = arith.constant 0 : index
    %12 = vector.load %arg5[%c0_9, %c0_10] : memref<1x128xf32, #tpu.memory_space<vmem>>, vector<1x128xf32>
    %13 = vector.broadcast %12 : vector<1x128xf32> to vector<8x128xf32>
    %14 = arith.addf %11, %13 : vector<8x128xf32>
    %cst_11 = arith.constant 0.000000e+00 : f32
    %15 = vector.broadcast %cst_11 : f32 to vector<8x128xf32>
    %16 = arith.maximumf %14, %15 : vector<8x128xf32>
    %17 = arith.truncf %16 : vector<8x128xf32> to vector<8x128xbf16>
    %c0_12 = arith.constant 0 : index
    %c0_13 = arith.constant 0 : index
    %18 = vector.load %arg6[%c0_12, %c0_13] : memref<128x128xbf16, #tpu.memory_space<vmem>>, vector<128x128xbf16>
    %cst_14 = arith.constant dense<0.000000e+00> : vector<8x128xf32>
    %19 = tpu.matmul %17, %18, %cst_14 {dimension_numbers = #tpu.dot_dimension_numbers<[1], [0], [0], [1], [0, 0, 1, 1], [], []>} : vector<8x128xbf16>, vector<128x128xbf16>, vector<8x128xf32> -> vector<8x128xf32>
    %c0_15 = arith.constant 0 : index
    %c0_16 = arith.constant 0 : index
    %20 = vector.load %arg7[%c0_15, %c0_16] : memref<1x128xf32, #tpu.memory_space<vmem>>, vector<1x128xf32>
    %21 = vector.broadcast %20 : vector<1x128xf32> to vector<8x128xf32>
    %22 = arith.addf %19, %21 : vector<8x128xf32>
    %c0_17 = arith.constant 0 : index
    %c0_18 = arith.constant 0 : index
    %23 = vector.load %arg8[%c0_17, %c0_18] : memref<8x128xf32, #tpu.memory_space<vmem>>, vector<8x128xf32>
    tpu.vector_store %arg8[%c0_17, %c0_18], %22 {strides = array<i32>} : memref<8x128xf32, #tpu.memory_space<vmem>>, vector<8x128xf32>,
    return
  }
  func.func @transform_0(%arg0: i32) -> (i32, i32) {
    %c0_i32 = arith.constant 0 : i32
    %c0_i32_0 = arith.constant 0 : i32
    return %arg0, %c0_i32 : i32, i32
  }
  func.func @transform_1(%arg0: i32) -> (i32, i32) {
    %c0_i32 = arith.constant 0 : i32
    %c0_i32_0 = arith.constant 0 : i32
    %c0_i32_1 = arith.constant 0 : i32
    return %c0_i32, %c0_i32_0 : i32, i32
  }
  func.func @transform_2(%arg0: i32) -> (i32, i32) {
    %c0_i32 = arith.constant 0 : i32
    %c0_i32_0 = arith.constant 0 : i32
    %c0_i32_1 = arith.constant 0 : i32
    return %c0_i32, %c0_i32_0 : i32, i32
  }
  func.func @transform_3(%arg0: i32) -> (i32, i32) {
    %c0_i32 = arith.constant 0 : i32
    %c0_i32_0 = arith.constant 0 : i32
    %c0_i32_1 = arith.constant 0 : i32
    return %c0_i32, %c0_i32_0 : i32, i32
  }
  func.func @transform_4(%arg0: i32) -> (i32, i32) {
    %c0_i32 = arith.constant 0 : i32
    %c0_i32_0 = arith.constant 0 : i32
    %c0_i32_1 = arith.constant 0 : i32
    return %c0_i32, %c0_i32_0 : i32, i32
  }
  func.func @transform_5(%arg0: i32) -> (i32, i32) {
    %c0_i32 = arith.constant 0 : i32
    %c0_i32_0 = arith.constant 0 : i32
    %c0_i32_1 = arith.constant 0 : i32
    return %c0_i32, %c0_i32_0 : i32, i32
  }
  func.func @transform_6(%arg0: i32) -> (i32, i32) {
    %c0_i32 = arith.constant 0 : i32
    %c0_i32_0 = arith.constant 0 : i32
    %c0_i32_1 = arith.constant 0 : i32
    return %c0_i32, %c0_i32_0 : i32, i32
  }
  func.func @transform_7(%arg0: i32) -> (i32, i32) {
    %c0_i32 = arith.constant 0 : i32
    %c0_i32_0 = arith.constant 0 : i32
    return %arg0, %c0_i32 : i32, i32
  }
}

</mosaic_0001>

<bundles_post_ra>
// kernel: _mlp_forward_pallas.1
= control target key start
LH: loop header
LB: loop body
LE: loop exit
PB: predicated region body
PF: predicated region fallthrough
CT: control target
= control target key end

     0   :  { %12 = vsyncpa [#allocation3], 0  ;;  %s615_s0 = inlined_call_operand.vmem [shape: f32[8,16], index: 0, kind: input, shape index: {}]   ;;  %s616_s1 = inlined_call_operand.vmem [shape: bf16[16,128], index: 1, kind: input, shape index: {}]   ;;  %s617_s2 = inlined_call_operand.vmem [shape: f32[1,128], index: 2, kind: input, shape index: {}]   ;;  %s618_s3 = inlined_call_operand.hbm [shape: bf16[128,128], index: 3, kind: input, shape index: {}]   ;;  %s619_s4 = inlined_call_operand.vmem [shape: f32[1,128], index: 4, kind: input, shape index: {}]   ;;  %s620_s5 = inlined_call_operand.hbm [shape: bf16[128,128], index: 5, kind: input, shape index: {}]   ;;  %s621_s6 = inlined_call_operand.vmem [shape: f32[1,128], index: 6, kind: input, shape index: {}]   ;;  %s622_s7 = inlined_call_operand.vmem [shape: f32[8,128], index: 7, kind: output, shape index: {}]  }
   0x1   :  { %13 = vsyncpa [#allocation5], 0  ;;  %s507_s24 = smov [#allocation2]   ;;  %s459_s28 = scalar_lea.hbm %s618_s3, 1024 }
   0x2   :  { %s25_s25 = sshll.u32 %s507_s24, 4  ;;  %p460_p0 = scmp.ne.s32.totalorder %s618_s3, %s459_s28  ;;  %s26_s25 = int_to_ptr.vmem [resolvable:$true] %s25_s25 }
   0x3   :  { %p463_p1 = scmp.lt.u32.totalorder %s459_s28, %s618_s3 }
   0x5   :  { %p465_p2 = pnand %p463_p1, %p460_p0 }
   0x7   :  { %468 = shalt.err (!%p465_p2)
}
   0x8   :  { %s469_s10 = scalar_lea.vmem %s26_s25, 1024  ;;  %p474_p4 = scmp.lt.s32.totalorder %s26_s25, %s26_s25 }
   0x9   :  { %p470_p3 = scmp.ne.s32.totalorder %s26_s25, %s469_s10  ;;  %p475_p5 = scmp.lt.s32.totalorder %s469_s10, %s469_s10 }
   0xb   :  { %p476_p6 = por %p475_p5, %p474_p4 }
   0xd   :  { %p477_p7 = pnand %p476_p6, %p470_p3 }
   0xf   :  { %480 = shalt.err (!%p477_p7)
}
  0x10   :  { %s508_s11 = smov 64   ;;  %s509_s12 = smov 4  }
  0x11   :  { %31 = dma.hbm_to_vmem [thread:$0]  %s618_s3, 1024, %s26_s25, [#allocation3], %s508_s11, %s508_s11, %s509_s12  }
  0x12   :  { %s510_s15 = smov [#allocation4]   ;;  %s481_s19 = scalar_lea.hbm %s620_s5, 1024 }
  0x13   :  { %s39_s16 = sshll.u32 %s510_s15, 4  ;;  %p482_p8 = scmp.ne.s32.totalorder %s620_s5, %s481_s19  ;;  %s40_s16 = int_to_ptr.vmem [resolvable:$true] %s39_s16 }
  0x14   :  { %p485_p9 = scmp.lt.u32.totalorder %s481_s19, %s620_s5 }
  0x16   :  { %p487_p10 = pnand %p485_p9, %p482_p8 }
  0x18   :  { %490 = shalt.err (!%p487_p10)
}
  0x19   :  { %s491_s24 = scalar_lea.vmem %s40_s16, 1024  ;;  %p496_p12 = scmp.lt.s32.totalorder %s40_s16, %s40_s16 }
  0x1a   :  { %p492_p11 = scmp.ne.s32.totalorder %s40_s16, %s491_s24  ;;  %p497_p13 = scmp.lt.s32.totalorder %s491_s24, %s491_s24 }
  0x1c   :  { %p498_p0 = por %p497_p13, %p496_p12 }
  0x1e   :  { %p499_p1 = pnand %p498_p0, %p492_p11 }
  0x20   :  { %502 = shalt.err (!%p499_p1)
}
  0x21   :  { %45 = dma.hbm_to_vmem [thread:$0]  %s620_s5, 1024, %s40_s16, [#allocation5], %s508_s11, %s508_s11, %s509_s12  }
  0x22   :  { %503 = dma.done.wait [#allocation3], 1024  }
  0x23   :  { %504 = vsyncadd [#allocation3], 4294966272 }
  0x24   :  { %505 = dma.done.wait [#allocation5], 1024  }
  0x25   :  { %506 = vsyncadd [#allocation5], 4294966272  ;;  %v511_v0 = vmov 0.0   ;;  %vm512_vm0 = vmmov 0   ;;  %v442_v1 = vld [vmem:[%s616_s1] sm:$0xff]   ;;  %vm72_vm1 = vcmask 130048  }
  0x26   :  { %390 = vmatprep.subr.bf16.mxu0 %v511_v0  ;;  %392 = vmatprep.mubr.msk.bf16.mxu0 %vm512_vm0, %v511_v0  ;;  %v55_v2 = vld [vmem:[%s615_s0] sm:$0xff]  ;;  %v444_v5 = vld [vmem:[#allocation2 + $0x8] sm:$0xff]   ;;  %v445_v6 = vld [vmem:[#allocation2 + $0x10] sm:$0xff]  }
  0x27   :  { %396 = vmatprep.subr.bf16.mxu1 %v511_v0  ;;  %412 = vmatprep.mubr.msk.bf16.mxu1 %vm512_vm0, %v511_v0  ;;  %v56_v3 = vpack.c.bf16 %v55_v2, %v55_v2  ;;  %v443_v4 = vld [vmem:[#allocation2] sm:$0xff]   ;;  %v446_v7 = vld [vmem:[#allocation2 + $0x18] sm:$0xff]   ;;  %v448_v9 = vld [vmem:[#allocation2 + $0x28] sm:$0xff]  }
  0x28   :  { %391 = vmatpush3.bf16.msra.mxu0 %v442_v1  ;;  %397 = vmatpush3.bf16.msra.mxu1 %v443_v4  ;;  %v447_v8 = vld [vmem:[#allocation2 + $0x20] sm:$0xff]   ;;  %v449_v10 = vld [vmem:[#allocation2 + $0x30] sm:$0xff]   ;;  %v450_v11 = vld [vmem:[#allocation2 + $0x38] sm:$0xff]  }
  0x29   :  { %416 = vmatprep.subr.bf16.mxu0 %v511_v0  ;;  %398 = vmatprep.subr.bf16.mxu1 %v511_v0  ;;  %v451_v12 = vld [vmem:[#allocation4] sm:$0xff]   ;;  %v452_v13 = vld [vmem:[#allocation4 + $0x8] sm:$0xff]   ;;  %v453_v14 = vld [vmem:[#allocation4 + $0x10] sm:$0xff]  }
  0x2a   :  { %v454_v15 = vld [vmem:[#allocation4 + $0x18] sm:$0xff]   ;;  %v455_v16 = vld [vmem:[#allocation4 + $0x20] sm:$0xff]   ;;  %v456_v17 = vld [vmem:[#allocation4 + $0x28] sm:$0xff]  }
  0x2b   :  { %393 = vmatmul.mubr.msk.bf16.vlgmr.msra.gmra.mrb[0].mxu0 %vm72_vm1, %v56_v3  ;;  %v349_v18 = vld [vmem:[%s617_s2] ss:$0 sm:$0xff]  ;;  %v457_v26 = vld [vmem:[#allocation4 + $0x30] sm:$0xff]   ;;  %v458_v27 = vld [vmem:[#allocation4 + $0x38] sm:$0xff]  }
  0x2c   :  { %432 = vmatprep.mubr.msk.bf16.mxu0 %vm512_vm0, %v511_v0  ;;  %399 = vmatpush3.bf16.msra.mxu1 %v444_v5  ;;  %v352_v28 = vld [vmem:[%s619_s4] ss:$0 sm:$0xff] }
  0x2d   :  { %400 = vmatprep.subr.bf16.mxu1 %v511_v0  ;;  %417 = vmatpush3.bf16.msra.mxu0 %v451_v12  ;;  %v361_v36 = vld [vmem:[%s621_s6] ss:$0 sm:$0xff] }
  0x2e   :  { %418 = vmatprep.subr.bf16.mxu0 %v511_v0 }
  0x30   :  { %401 = vmatpush3.bf16.msra.mxu1 %v445_v6 }
  0x31   :  { %402 = vmatprep.subr.bf16.mxu1 %v511_v0  ;;  %419 = vmatpush3.bf16.msra.mxu0 %v452_v13 }
  0x32   :  { %420 = vmatprep.subr.bf16.mxu0 %v511_v0 }
  0x34   :  { %403 = vmatpush3.bf16.msra.mxu1 %v446_v7 }
  0x35   :  { %404 = vmatprep.subr.bf16.mxu1 %v511_v0  ;;  %421 = vmatpush3.bf16.msra.mxu0 %v453_v14 }
  0x36   :  { %422 = vmatprep.subr.bf16.mxu0 %v511_v0 }
  0x38   :  { %405 = vmatpush3.bf16.msra.mxu1 %v447_v8 }
  0x39   :  { %406 = vmatprep.subr.bf16.mxu1 %v511_v0  ;;  %423 = vmatpush3.bf16.msra.mxu0 %v454_v15 }
  0x3a   :  { %424 = vmatprep.subr.bf16.mxu0 %v511_v0 }
  0x3c   :  { %407 = vmatpush3.bf16.msra.mxu1 %v448_v9 }
  0x3d   :  { %408 = vmatprep.subr.bf16.mxu1 %v511_v0  ;;  %425 = vmatpush3.bf16.msra.mxu0 %v455_v16 }
  0x3e   :  { %426 = vmatprep.subr.bf16.mxu0 %v511_v0 }
  0x40   :  { %409 = vmatpush3.bf16.msra.mxu1 %v449_v10 }
  0x41   :  { %410 = vmatprep.subr.bf16.mxu1 %v511_v0  ;;  %427 = vmatpush3.bf16.msra.mxu0 %v456_v17 }
  0x42   :  { %428 = vmatprep.subr.bf16.mxu0 %v511_v0 }
  0x44   :  { %411 = vmatpush3.bf16.msra.mxu1 %v450_v11 }
  0x45   :  { %429 = vmatpush3.bf16.msra.mxu0 %v457_v26 }
  0x46   :  { %430 = vmatprep.subr.bf16.mxu0 %v511_v0 }
  0x49   :  { %431 = vmatpush3.bf16.msra.mxu0 %v458_v27 }
  0xfe   :  { %v110_v19 = vpop.f32.mrb[0].mxu0 }
  0xff   :  { %v111_v20 = vadd.f32 %v349_v18, %v110_v19  ;;  %v394_v21 = vpop.f32.mrb[1].mxu0 }
 0x100   :  { %v113_v22 = vpop.f32.mrb[2].mxu0 }
 0x101   :  { %v116_v23 = vmax.f32 %v111_v20, 0.0  ;;  %v395_v24 = vpop.f32.mrb[3].mxu0 }
 0x103   :  { %v117_v25 = vpack.c.bf16 %v116_v23, %v116_v23 }
 0x105   :  { %413 = vmatmul.mubr.bf16.vlgmr.msra.gmra.mrb[0].mxu1 %v117_v25 }
 0x1d8   :  { %v223_v29 = vpop.f32.mrb[0].mxu1 }
 0x1d9   :  { %v224_v30 = vadd.f32 %v352_v28, %v223_v29  ;;  %v414_v31 = vpop.f32.mrb[1].mxu1 }
 0x1da   :  { %v226_v32 = vpop.f32.mrb[2].mxu1 }
 0x1db   :  { %v229_v33 = vmax.f32 %v224_v30, 0.0  ;;  %v415_v34 = vpop.f32.mrb[3].mxu1 }
 0x1dd   :  { %v230_v35 = vpack.c.bf16 %v229_v33, %v229_v33 }
 0x1df   :  { %433 = vmatmul.mubr.bf16.vlgmr.msra.gmra.mrb[4].mxu0 %v230_v35 }
 0x2b2   :  { %v336_v37 = vpop.f32.mrb[4].mxu0 }
 0x2b3   :  { %v337_v38 = vadd.f32 %v361_v36, %v336_v37  ;;  %v434_v39 = vpop.f32.mrb[5].mxu0 }
 0x2b4   :  { %v339_v40 = vpop.f32.mrb[6].mxu0 }
 0x2b5   :  { %342 = vst [vmem:[%s622_s7] sm:$0xff] %v337_v38  ;;  %v435_v41 = vpop.f32.mrb[7].mxu0 }
 0x2b6   :  { %347 = vsyncpa [#allocation3], 1 }
 0x2b7   :  { %348 = vsyncpa [#allocation5], 1 }

</bundles_post_ra>
